<compile_context>
chip_gen: v5e
topology: v5e:2x2
jax: 0.10.0
libtpu: 0.0.40
codegen_flags: <defaults>
</compile_context>

<pallas_src>
import functools

import jax
import jax.numpy as jnp
import numpy as np
from jax.experimental import pallas as pl
from jax.experimental.pallas import tpu as pltpu

# ----------------------- hyperparameters (module defaults) -----------------------
N_CLASSES = 10
POOLING_SIZE = 4          # act_size in compute_LLS
TEMPERATURE = 1.0
LABEL_SMOOTHING = 0.0
MAX_FREQ = 512.0          # compute_LLS passes max_freq=512
MIN_FREQ = 50.0
WAVEFORM = "cosine"       # default -> keep sin(), no sign()


# --------------------------- hoisted constant builders ---------------------------
@functools.lru_cache(maxsize=None)
def _make_basis(d):
    """generate_frequency_matrix(n_classes, d, max_freq=512) / d, waveform='cosine'."""
    freqs = np.linspace(MIN_FREQ, MAX_FREQ, N_CLASSES, dtype=np.float32).reshape(N_CLASSES, 1)
    t = np.arange(d, dtype=np.float32).reshape(1, d)
    basis = np.sin(freqs * t)
    if WAVEFORM == "square":
        basis = np.sign(basis)
    return jnp.asarray((basis / d).astype(np.float32))


@functools.lru_cache(maxsize=None)
def _pool_matrix(h, w, p):
    """Constant [H*W, P*P] matrix A such that out2d @ A == adaptive_avg_pool2d(out, (P, P))
    flattened in (ph, pw) order.  Requires H % P == 0 and W % P == 0."""
    kh, kw = h // p, w // p
    s = np.arange(h * w)
    hh, ww = s // w, s % w
    col = (hh // kh) * p + (ww // kw)
    a = np.zeros((h * w, p * p), dtype=np.float32)
    a[s, col] = 1.0 / (kh * kw)
    return jnp.asarray(a)


def _choose_spatial_tile(s, cin, cout, vmem_budget_bytes=8 << 20):
    """Largest multiple-of-128 divisor of S whose double-buffered x+out tiles fit the budget."""
    if s % 128 != 0:
        return s                                   # fall back to one full-spatial block
    best = 128
    for ts in range(128, s + 1, 128):
        if s % ts == 0 and 2 * (cin + cout) * ts * 4 <= vmem_budget_bytes:
            best = ts
    return best


# ----------------------------- Pallas kernels ------------------------------------
def fused_block_pool_kernel(x_ref, wt_ref, b_ref, poolmat_ref, out_ref, pooled_ref):
    """conv1x1 + ReLU on a lane-dense [Cout, TS] tile, with fused partial avg-pooling.

    x_ref:       [1, Cin, TS]   (spatial on the lane axis)
    wt_ref:      [Cout, Cin]    (transposed conv weight)
    b_ref:       [Cout, 1]      (bias)
    poolmat_ref: [TS, P*P]      (constant pooling matrix slice, entries 1/(kh*kw))
    out_ref:     [1, Cout, TS]  (streamed to HBM, lane-dense stores)
    pooled_ref:  [1, Cout, P*P] (resident accumulator across the spatial grid axis)
    """
    x = x_ref[0]                       # [Cin, TS]
    wt = wt_ref[...]                   # [Cout, Cin]
    bias = b_ref[...]                  # [Cout, 1]
    cin = x.shape[0]

    if cin <= 8:
        # 1x1 conv as Cin broadcast-FMAs on the VPU (K=Cin far too small for the MXU).
        y = wt[:, 0:1] * x[0:1, :] + bias
        for ci in range(1, cin):
            y = y + wt[:, ci:ci + 1] * x[ci:ci + 1, :]
    else:
        y = jax.lax.dot_general(wt, x, (((1,), (0,)), ((), ())),
                                preferred_element_type=jnp.float32) + bias
    y = jnp.maximum(y, 0.0)            # ReLU
    out_ref[0] = y.astype(out_ref.dtype)

    # Fused adaptive_avg_pool2d: this tile's contribution to the pooled means.
    part = jnp.dot(y, poolmat_ref[...], preferred_element_type=jnp.float32)  # [Cout, P*P]

    @pl.when(pl.program_id(1) == 0)    # first spatial tile of this batch element
    def _init():
        pooled_ref[0] = jnp.zeros_like(part)

    pooled_ref[0] = pooled_ref[0] + part


def lls_loss_kernel(latents_ref, basis_ref, labels_ref, loss_ref):
    """compute_LLS tail: latents @ basis.T / T -> label-smoothed cross entropy (mean)."""
    latents = latents_ref[...]                                    # [B, D]
    logits = jax.lax.dot_general(latents, basis_ref[...],         # latents @ basis.T
                                 (((1,), (1,)), ((), ())),
                                 preferred_element_type=jnp.float32)
    logits = logits * (1.0 / TEMPERATURE)                         # [B, n_classes]
    m = jnp.max(logits, axis=-1, keepdims=True)
    lse = m + jnp.log(jnp.sum(jnp.exp(logits - m), axis=-1, keepdims=True))
    logp = logits - lse
    cls = jax.lax.broadcasted_iota(jnp.int32, logits.shape, 1)
    picked = jnp.where(cls == labels_ref[...], logp, 0.0)         # labels: [B, 1] int32
    nll = -jnp.sum(picked, axis=-1, keepdims=True)                # [B, 1]
    smooth = -jnp.mean(logp, axis=-1, keepdims=True)
    per_sample = (1.0 - LABEL_SMOOTHING) * nll + LABEL_SMOOTHING * smooth
    loss_ref[0, 0] = jnp.mean(per_sample)


# ------------------------------- wrapper -------------------------------------------
def lls_layer_forward(x, labels, w, b, *, spatial_tile=None):
    """LocalLearningSignalGenerationLayer.forward, training_mode='LLS', training=True.

    Returns (out, loss): out = relu(conv1x1(x)) in NCHW, loss = compute_LLS(out, labels).
    """
    B, Cin, H, W = x.shape
    Cout = w.shape[1]
    P = POOLING_SIZE
    # TODO(synk): PyTorch adaptive_avg_pool2d also handles H, W not divisible by pooling_size.
    assert H % P == 0 and W % P == 0, "H and W must be divisible by pooling_size"
    S = H * W
    PP = P * P
    TS = _choose_spatial_tile(S, Cin, Cout) if spatial_tile is None else spatial_tile
    assert S % TS == 0 and (TS % 128 == 0 or TS == S), "bad spatial tile"

    x3 = x.reshape(B, Cin, S)                 # free reshape (NCHW is row-major)
    wt = jnp.transpose(w)                     # [Cout, Cin] (tiny)
    b2 = b.reshape(Cout, 1)
    poolmat = _pool_matrix(H, W, P)           # [S, P*P] constant

    flops = 2 * B * S * Cin * Cout + 2 * B * S * PP * Cout
    bytes_accessed = 4 * (B * Cin * S + B * Cout * S + B * Cout * PP
                          + Cin * Cout + Cout + S * PP)

    out3, pooled = pl.pallas_call(
        fused_block_pool_kernel,
        out_shape=(jax.ShapeDtypeStruct((B, Cout, S), jnp.float32),
                   jax.ShapeDtypeStruct((B, Cout, PP), jnp.float32)),
        grid=(B, S // TS),
        in_specs=[
            pl.BlockSpec((1, Cin, TS), lambda bb, t: (bb, 0, t)),
            pl.BlockSpec((Cout, Cin), lambda bb, t: (0, 0)),
            pl.BlockSpec((Cout, 1), lambda bb, t: (0, 0)),
            pl.BlockSpec((TS, PP), lambda bb, t: (t, 0)),
        ],
        out_specs=(
            pl.BlockSpec((1, Cout, TS), lambda bb, t: (bb, 0, t)),   # streamed, lane-dense
            pl.BlockSpec((1, Cout, PP), lambda bb, t: (bb, 0, 0)),   # resident accumulator
        ),
        compiler_params=pltpu.CompilerParams(
            dimension_semantics=("parallel", "arbitrary")),
        cost_estimate=pl.CostEstimate(flops=flops, transcendentals=0,
                                      bytes_accessed=bytes_accessed),
    )(x3, wt, b2, poolmat)

    # pooled[b, c, ph*P+pw] -> flatten order (c, ph, pw) matches torch's .view(B, -1)
    latents = pooled.reshape(B, Cout * PP)          # free reshape; tiny tensor from here on
    basis = _make_basis(Cout * PP)                  # [n_classes, D], hoisted constant
    labels2 = labels.reshape(B, 1).astype(jnp.int32)

    loss = pl.pallas_call(
        lls_loss_kernel,
        out_shape=jax.ShapeDtypeStruct((1, 1), jnp.float32),
        grid=(1,),
        in_specs=[
            pl.BlockSpec((B, Cout * PP), lambda i: (0, 0)),
            pl.BlockSpec((N_CLASSES, Cout * PP), lambda i: (0, 0)),
            pl.BlockSpec((B, 1), lambda i: (0, 0)),
        ],
        out_specs=pl.BlockSpec((1, 1), lambda i: (0, 0)),
        compiler_params=pltpu.CompilerParams(dimension_semantics=("arbitrary",)),
    )(latents, basis, labels2)[0, 0]

    out = out3.reshape(B, Cout, H, W)               # free reshape back to NCHW
    return out, loss


# ------------------------------ pure-JAX reference ---------------------------------
def reference_forward(x, labels, w, b):
    B, Cin, H, W = x.shape
    Cout = w.shape[1]
    out = jnp.einsum("bihw,io->bohw", x, w, precision="highest") + b.reshape(1, Cout, 1, 1)
    out = jnp.maximum(out, 0.0)
    P = POOLING_SIZE
    kh, kw = H // P, W // P
    latents = out.reshape(B, Cout, P, kh, P, kw).mean(axis=(3, 5)).reshape(B, -1)
    basis = _make_basis(latents.shape[1])
    logits = jnp.dot(latents, basis.T, precision="highest") / TEMPERATURE
    logp = jax.nn.log_softmax(logits, axis=-1)
    oh = jax.nn.one_hot(labels, N_CLASSES, dtype=jnp.float32)
    nll = -jnp.sum(oh * logp, axis=-1)
    smooth = -jnp.mean(logp, axis=-1)
    loss = jnp.mean((1.0 - LABEL_SMOOTHING) * nll + LABEL_SMOOTHING * smooth)
    return out, loss


# ------------------------------------ main -----------------------------------------
if __name__ == "__main__":
    key = jax.random.PRNGKey(0)
    kx, kw_, kb = jax.random.split(key, 3)

    B, Cin, H, W = 2, 4, 16, 16
    Cout = 8

    x = jax.random.normal(kx, (B, Cin, H, W), dtype=jnp.float32)
    labels = jnp.array([3, 7], dtype=jnp.int32)

    # deterministic block (Conv2d 1x1 + ReLU) parameters
    w = jax.random.normal(kw_, (Cin, Cout), dtype=jnp.float32) * 0.2
    b = jax.random.normal(kb, (1, Cout), dtype=jnp.float32) * 0.05

    ref_out, ref_loss = reference_forward(x, labels, w, b)

    # exercise both the multi-tile (spatial_tile=128 -> 2 spatial steps, accumulate path)
    # and the auto-sized single-tile path.
    for ts in (128, None):
        out, loss = lls_layer_forward(x, labels, w, b, spatial_tile=ts)
        out = jax.block_until_ready(out)
        loss = jax.block_until_ready(loss)
        np.testing.assert_allclose(np.asarray(out), np.asarray(ref_out), rtol=1e-5, atol=1e-5)
        np.testing.assert_allclose(np.asarray(loss), np.asarray(ref_loss), rtol=1e-4, atol=1e-5)

    print("KERNEL_OK")
</pallas_src>

<mosaic_0001>
module attributes {stable_mosaic.version = 11 : i64} {
  func.func @fused_block_pool_kernel(%arg0: i32, %arg1: i32, %arg2: memref<1x4x128xf32, #tpu.memory_space<vmem>>, %arg3: memref<8x4xf32, #tpu.memory_space<vmem>>, %arg4: memref<8x1xf32, #tpu.memory_space<vmem>>, %arg5: memref<128x16xf32, #tpu.memory_space<vmem>>, %arg6: memref<1x8x128xf32, #tpu.memory_space<vmem>>, %arg7: memref<1x8x16xf32, #tpu.memory_space<vmem>>) attributes {dimension_semantics = [#tpu.dimension_semantics<parallel>, #tpu.dimension_semantics<arbitrary>], iteration_bounds = array<i64: 2, 2>, scalar_prefetch = 0 : i64, scratch_operands = 0 : i64, tpu.core_type = #tpu.core_type<tc>, window_params = [{transform_indices = @transform_0, window_bounds = array<i64: 1, 4, 128>}, {pipeline_mode = #tpu.pipeline_mode<synchronous>, transform_indices = @transform_1, window_bounds = array<i64: 8, 4>}, {pipeline_mode = #tpu.pipeline_mode<synchronous>, transform_indices = @transform_2, window_bounds = array<i64: 8, 1>}, {transform_indices = @transform_3, window_bounds = array<i64: 128, 16>}, {transform_indices = @transform_4, window_bounds = array<i64: 1, 8, 128>}, {transform_indices = @transform_5, window_bounds = array<i64: 1, 8, 16>}]} {
    %c0 = arith.constant 0 : index
    %c0_0 = arith.constant 0 : index
    %c0_1 = arith.constant 0 : index
    %0 = vector.load %arg2[%c0, %c0_0, %c0_1] : memref<1x4x128xf32, #tpu.memory_space<vmem>>, vector<1x4x128xf32>
    %1 = vector.shape_cast %0 : vector<1x4x128xf32> to vector<4x128xf32>
    %c0_2 = arith.constant 0 : index
    %c0_3 = arith.constant 0 : index
    %2 = vector.load %arg3[%c0_2, %c0_3] : memref<8x4xf32, #tpu.memory_space<vmem>>, vector<8x4xf32>
    %c0_4 = arith.constant 0 : index
    %c0_5 = arith.constant 0 : index
    %3 = vector.load %arg4[%c0_4, %c0_5] : memref<8x1xf32, #tpu.memory_space<vmem>>, vector<8x1xf32>
    %4 = vector.extract_strided_slice %2 {offsets = [0, 0], sizes = [8, 1], strides = [1, 1]} : vector<8x4xf32> to vector<8x1xf32>
    %5 = vector.extract_strided_slice %1 {offsets = [0, 0], sizes = [1, 128], strides = [1, 1]} : vector<4x128xf32> to vector<1x128xf32>
    %6 = vector.broadcast %4 : vector<8x1xf32> to vector<8x128xf32>
    %7 = vector.broadcast %5 : vector<1x128xf32> to vector<8x128xf32>
    %8 = arith.mulf %6, %7 : vector<8x128xf32>
    %9 = vector.broadcast %3 : vector<8x1xf32> to vector<8x128xf32>
    %10 = arith.addf %8, %9 : vector<8x128xf32>
    %11 = vector.extract_strided_slice %2 {offsets = [0, 1], sizes = [8, 1], strides = [1, 1]} : vector<8x4xf32> to vector<8x1xf32>
    %12 = vector.extract_strided_slice %1 {offsets = [1, 0], sizes = [1, 128], strides = [1, 1]} : vector<4x128xf32> to vector<1x128xf32>
    %13 = vector.broadcast %11 : vector<8x1xf32> to vector<8x128xf32>
    %14 = vector.broadcast %12 : vector<1x128xf32> to vector<8x128xf32>
    %15 = arith.mulf %13, %14 : vector<8x128xf32>
    %16 = arith.addf %10, %15 : vector<8x128xf32>
    %17 = vector.extract_strided_slice %2 {offsets = [0, 2], sizes = [8, 1], strides = [1, 1]} : vector<8x4xf32> to vector<8x1xf32>
    %18 = vector.extract_strided_slice %1 {offsets = [2, 0], sizes = [1, 128], strides = [1, 1]} : vector<4x128xf32> to vector<1x128xf32>
    %19 = vector.broadcast %17 : vector<8x1xf32> to vector<8x128xf32>
    %20 = vector.broadcast %18 : vector<1x128xf32> to vector<8x128xf32>
    %21 = arith.mulf %19, %20 : vector<8x128xf32>
    %22 = arith.addf %16, %21 : vector<8x128xf32>
    %23 = vector.extract_strided_slice %2 {offsets = [0, 3], sizes = [8, 1], strides = [1, 1]} : vector<8x4xf32> to vector<8x1xf32>
    %24 = vector.extract_strided_slice %1 {offsets = [3, 0], sizes = [1, 128], strides = [1, 1]} : vector<4x128xf32> to vector<1x128xf32>
    %25 = vector.broadcast %23 : vector<8x1xf32> to vector<8x128xf32>
    %26 = vector.broadcast %24 : vector<1x128xf32> to vector<8x128xf32>
    %27 = arith.mulf %25, %26 : vector<8x128xf32>
    %28 = arith.addf %22, %27 : vector<8x128xf32>
    %cst = arith.constant 0.000000e+00 : f32
    %29 = vector.broadcast %cst : f32 to vector<8x128xf32>
    %30 = arith.maximumf %28, %29 : vector<8x128xf32>
    %c0_6 = arith.constant 0 : index
    %c0_7 = arith.constant 0 : index
    %c0_8 = arith.constant 0 : index
    %31 = vector.load %arg6[%c0_6, %c0_7, %c0_8] : memref<1x8x128xf32, #tpu.memory_space<vmem>>, vector<1x8x128xf32>
    %32 = vector.shape_cast %31 : vector<1x8x128xf32> to vector<8x128xf32>
    %33 = vector.shape_cast %30 : vector<8x128xf32> to vector<1x8x128xf32>
    tpu.vector_store %arg6[%c0_6, %c0_7, %c0_8], %33 {strides = array<i32>} : memref<1x8x128xf32, #tpu.memory_space<vmem>>, vector<1x8x128xf32>,
    %c0_9 = arith.constant 0 : index
    %c0_10 = arith.constant 0 : index
    %34 = vector.load %arg5[%c0_9, %c0_10] : memref<128x16xf32, #tpu.memory_space<vmem>>, vector<128x16xf32>
    %cst_11 = arith.constant dense<0.000000e+00> : vector<8x16xf32>
    %35 = tpu.matmul %30, %34, %cst_11 {dimension_numbers = #tpu.dot_dimension_numbers<[1], [0], [0], [1], [0, 0, 1, 1], [], []>} : vector<8x128xf32>, vector<128x16xf32>, vector<8x16xf32> -> vector<8x16xf32>
    %c0_i32 = arith.constant 0 : i32
    %36 = arith.cmpi eq, %arg1, %c0_i32 : i32
    %37 = arith.extui %36 : i1 to i32
    %c0_i32_12 = arith.constant 0 : i32
    %38 = arith.cmpi ne, %37, %c0_i32_12 : i32
    scf.if %38 {
      %cst_19 = arith.constant 0.000000e+00 : f32
      %45 = vector.broadcast %cst_19 : f32 to vector<8x16xf32>
      %c0_20 = arith.constant 0 : index
      %c0_21 = arith.constant 0 : index
      %c0_22 = arith.constant 0 : index
      %46 = vector.load %arg7[%c0_20, %c0_21, %c0_22] : memref<1x8x16xf32, #tpu.memory_space<vmem>>, vector<1x8x16xf32>
      %47 = vector.shape_cast %46 : vector<1x8x16xf32> to vector<8x16xf32>
      %48 = vector.shape_cast %45 : vector<8x16xf32> to vector<1x8x16xf32>
      tpu.vector_store %arg7[%c0_20, %c0_21, %c0_22], %48 {strides = array<i32>} : memref<1x8x16xf32, #tpu.memory_space<vmem>>, vector<1x8x16xf32>,
    } else {
    }
    %c0_13 = arith.constant 0 : index
    %c0_14 = arith.constant 0 : index
    %c0_15 = arith.constant 0 : index
    %39 = vector.load %arg7[%c0_13, %c0_14, %c0_15] : memref<1x8x16xf32, #tpu.memory_space<vmem>>, vector<1x8x16xf32>
    %40 = vector.shape_cast %39 : vector<1x8x16xf32> to vector<8x16xf32>
    %41 = arith.addf %40, %35 : vector<8x16xf32>
    %c0_16 = arith.constant 0 : index
    %c0_17 = arith.constant 0 : index
    %c0_18 = arith.constant 0 : index
    %42 = vector.load %arg7[%c0_16, %c0_17, %c0_18] : memref<1x8x16xf32, #tpu.memory_space<vmem>>, vector<1x8x16xf32>
    %43 = vector.shape_cast %42 : vector<1x8x16xf32> to vector<8x16xf32>
    %44 = vector.shape_cast %41 : vector<8x16xf32> to vector<1x8x16xf32>
    tpu.vector_store %arg7[%c0_16, %c0_17, %c0_18], %44 {strides = array<i32>} : memref<1x8x16xf32, #tpu.memory_space<vmem>>, vector<1x8x16xf32>,
    return
  }
  func.func @transform_0(%arg0: i32, %arg1: i32) -> (i32, i32, i32) {
    %c0_i32 = arith.constant 0 : i32
    %c0_i32_0 = arith.constant 0 : i32
    return %arg0, %c0_i32, %arg1 : i32, i32, i32
  }
  func.func @transform_1(%arg0: i32, %arg1: i32) -> (i32, i32) {
    %c0_i32 = arith.constant 0 : i32
    %c0_i32_0 = arith.constant 0 : i32
    %c0_i32_1 = arith.constant 0 : i32
    return %c0_i32, %c0_i32_0 : i32, i32
  }
  func.func @transform_2(%arg0: i32, %arg1: i32) -> (i32, i32) {
    %c0_i32 = arith.constant 0 : i32
    %c0_i32_0 = arith.constant 0 : i32
    %c0_i32_1 = arith.constant 0 : i32
    return %c0_i32, %c0_i32_0 : i32, i32
  }
  func.func @transform_3(%arg0: i32, %arg1: i32) -> (i32, i32) {
    %c0_i32 = arith.constant 0 : i32
    %c0_i32_0 = arith.constant 0 : i32
    return %arg1, %c0_i32 : i32, i32
  }
  func.func @transform_4(%arg0: i32, %arg1: i32) -> (i32, i32, i32) {
    %c0_i32 = arith.constant 0 : i32
    %c0_i32_0 = arith.constant 0 : i32
    return %arg0, %c0_i32, %arg1 : i32, i32, i32
  }
  func.func @transform_5(%arg0: i32, %arg1: i32) -> (i32, i32, i32) {
    %c0_i32 = arith.constant 0 : i32
    %c0_i32_0 = arith.constant 0 : i32
    %c0_i32_1 = arith.constant 0 : i32
    return %arg0, %c0_i32, %c0_i32_0 : i32, i32, i32
  }
}

</mosaic_0001>

<bundles_post_ra>
// kernel: tpu_custom_call.1
= control target key start
LH: loop header
LB: loop body
LE: loop exit
PB: predicated region body
PF: predicated region fallthrough
CT: control target
= control target key end

     0   :  { %s1084_s0 = inlined_call_operand.vmem [shape: f32[2,4,256], index: 0, kind: input, shape index: {}]   ;;  %s1085_s1 = inlined_call_operand.vmem [shape: f32[8,4], index: 1, kind: input, shape index: {}]   ;;  %s1086_s2 = inlined_call_operand.vmem [shape: f32[8,1], index: 2, kind: input, shape index: {}]   ;;  %s1087_s3 = inlined_call_operand.vmem [shape: f32[256,16], index: 3, kind: input, shape index: {}]   ;;  %s1088_s4 = inlined_call_operand.hbm [shape: f32[2,8,256], index: 4, kind: output, shape index: {0}]   ;;  %s1089_s5 = inlined_call_operand.hbm [shape: f32[2,8,16], index: 5, kind: output, shape index: {1}]  }
   0x1   :  { %1097 = sst [smem:[#allocation15_spill]] %s1084_s0 }
   0x2   :  { %1098 = sst [smem:[#allocation16_spill]] %s1085_s1 }
   0x3   :  { %1099 = sst [smem:[#allocation17_spill]] %s1086_s2 }
   0x4   :  { %1100 = sst [smem:[#allocation18_spill]] %s1087_s3 }
   0x5   :  { %11 = vsyncpa [#allocation3], 0 }
   0x6   :  { %13 = vsyncpa [#allocation3 + $0x1], 0 }
   0x7   :  { %14 = vsyncpa [#allocation5], 0 }
   0x8   :  { %16 = vsyncpa [#allocation5 + $0x1], 0  ;;  %s842_s18 = smov 0   ;;  %s844_s19 = smov 0  }
   0x9   :  { %s846_s20 = smov 0   ;;  %s848_s21 = smov 0  }
   0xa   :  { %s850_s22 = smov 0   ;;  %s852_s23 = smov 0  }
   0xb   :  { %s854_s24 = smov 0   ;;  %s856_s25 = smov 0  }
   0xc   :  { %s858_s26 = smov 0   ;;  %s860_s27 = smov 0  }
   0xd   :  { %s862_s28 = smov 0  }
   0xe LB: > { %1101 = sst [smem:[#allocation8_spill]] %s785_s23  ;;  %s526_s29 = sadd.s32 4294967295, %s805_s28   ;;  %s805_s28 = sphi %s862_s28, %s22_s28   ;;  %s801_s27 = sphi %s860_s27, %s1126_s27   ;;  %s797_s26 = sphi %s858_s26, %s1125_s26   ;;  %s793_s25 = sphi %s856_s25, %s1124_s25   ;;  %s789_s24 = sphi %s854_s24, %s1123_s24   ;;  %s785_s23 = sphi %s852_s23, %s1122_s23   ;;  %s781_s22 = sphi %s850_s22, %s1131_s22   ;;  %s777_s21 = sphi %s848_s21, %s1130_s21   ;;  %s773_s20 = sphi %s846_s20, %s1129_s20   ;;  %s769_s19 = sphi %s844_s19, %s1128_s19   ;;  %s765_s18 = sphi %s842_s18, %s1127_s18  }
   0xf   : > { %1102 = sst [smem:[#allocation9_spill]] %s797_s26  ;;  %s527_s30 = sadd.s32 4294967294, %s805_s28  }
  0x10   : > { %1103 = sst [smem:[#allocation10_spill]] %s801_s27  ;;  %s31_s6 = sadd.s32 1, %s797_s26 }
  0x11   : > { %s34_s7 = sadd.s32 1, %s801_s27  ;;  %p32_p0 = scmp.ge.s32.totalorder %s31_s6, 2 }
  0x12   : > { %s139_s8 = sadd.s32 1, %s785_s23  ;;  %p149_p1 = scmp.ne.s32.totalorder %s785_s23, %s781_s22 }
  0x13   : > { %p904_p2 = scmp.eq.s32.totalorder %s526_s29, 3  ;;  %s1133_s6 = smov (%p32_p0, %s31_s6), 0 }
  0x14   : > { %1105 = sst [smem:[#allocation11_spill]] %s1133_s6  ;;  %s1135_s7 = smov (!%p32_p0, %s34_s7), %s801_s27 }
  0x15   : > { %s135_s10 = ssub.s32 %s797_s26, %s1133_s6  ;;  %p915_p3 = por %p904_p2, %p149_p1 }
  0x16   : > { %p36_p4 = scmp.ge.s32.totalorder %s1135_s7, 2  ;;  %p155_p5 = scmp.ne.s32.totalorder %s781_s22, %s777_s21 }
  0x17   : > { %p921_p6 = scmp.eq.s32.totalorder %s527_s30, 3  ;;  %s165_s13 = sadd.s32 1, %s773_s20 }
  0x18   : > { %s1137_s7 = smov (%p36_p4, %s1135_s7), 0  ;;  %p175_p8 = scmp.ne.s32.totalorder %s773_s20, %s769_s19 }
  0x19   : > { %1108 = sst [smem:[#allocation12_spill]] %s1137_s7  ;;  %p930_p7 = por %p921_p6, %p155_p5 }
  0x1a   : > { %s134_s15 = ssub.s32 %s801_s27, %s1137_s7  ;;  %p181_p9 = scmp.ne.s32.totalorder %s769_s19, %s765_s18 }
  0x1b   : > { %s136_s16 = sor.u32 %s135_s10, %s134_s15  ;;  %p163_p10 = scmp.eq.s32.totalorder %s134_s15, 0 }
  0x1c   : > { %p137_p11 = scmp.eq.s32.totalorder %s136_s16, 0  ;;  %p942_p12 = por %p175_p8, %p904_p2 }
  0x1d   : > { %s947_s29 = scalar_select %p163_p10, %s773_s20, %s165_s13  }
  0x1e   : > { %s950_s30 = scalar_select %p137_p11, %s785_s23, %s139_s8  }
  0x1f   : > { %1111 = sst [smem:[#allocation13_spill]] %s947_s29  ;;  %p954_p13 = por %p181_p9, %p921_p6 }
  0x20   : > { %1112 = sst [smem:[#allocation14_spill]] %s950_s30  ;;  %p530_p0 = scmp.ge.s32.totalorder %s805_s28, 1 }
  0x21   : > { %p226_p1 = scmp.lt.s32.totalorder %s805_s28, 5 }
  0x23   : > { %p227_p4 = pnand %p530_p0, %p226_p1 }
  0x24   : > { %s1114_s1 = sld [smem:[#allocation16_spill]] (!%p227_p4)  ;;  %s1092_s8 = sand.u32 (!%p227_p4), 1, %s769_s19  }
  0x25   : > { %230 = sbr.rel (%p227_p4) target bundleno = 335 (0x14f), region = 36  ;;  %s535_s9 = sshll.u32 (!%p227_p4), %s789_s24, 4 }
  0x26   : > { %s967_s12 = sshll.u32 (!%p227_p4), %s1092_s8, 3  ;;  %p276_p2 = scmp.lt.s32.totalorder (!%p227_p4), %s535_s9, 31 }
  0x27   : > { %s1115_s2 = sld [smem:[#allocation17_spill]] (!%p227_p4)  ;;  %p267_p5 = scmp.lt.s32.totalorder (!%p227_p4), %s793_s25, 1 }
  0x28   : > { %s1116_s3 = sld [smem:[#allocation18_spill]] (!%p227_p4)  ;;  %p269_p6 = scmp.lt.s32.totalorder (!%p227_p4), %s789_s24, 1 }
  0x29   : > { %s1117_s0 = sld [smem:[#allocation15_spill]] (!%p227_p4)  ;;  %p537_p8 = scmp.ne.s32.totalorder (!%p227_p4), %s789_s24, 0 }
  0x2a   : > { %v282_v0 = vld [vmem:[%s1114_s1] sm:$0xff]  ;;  %v807_v1 = vmov 0   ;;  %v808_v2 = vmov 1   ;;  %v809_v3 = vmov 3   ;;  %s1139_s9 = smov (!%p276_p2, %s535_s9), 31  ;;  %v810_v7 = vmov 2  }
  0x2b   : > { %650 = vset.pattern.permute.xlu0 %v807_v1  ;;  %651 = vset.pattern.permute.xlu1 %v808_v2  ;;  %s536_s13 = sshll.u32 %s1139_s9, 3 }
  0x2c   : > { %286 = vperm.xlu0 %650, %v282_v0   ;;  %298 = vperm.xlu1 %651, %v282_v0   ;;  %s268_s1 = scalar_select %p267_p5, %s793_s25, 1 }
  0x2d   : > { %653 = vset.pattern.permute.xlu2 %v809_v3  ;;  %v283_v4 = vld [vmem:[%s1115_s2] sm:$0xff]  ;;  %s270_s9 = scalar_select %p269_p6, %s789_s24, 1 }
  0x2e   : > { %312 = vperm.xlu2 %653, %v282_v0   ;;  %s975_s7 = scalar_lea.vmem %s1116_s3, %s536_s13  ;;  %s533_s13 = sshll.u32 %s268_s1, 1 }
  0x2f   : > { %v335_v5 = vld [vmem:[%s975_s7 + $0x78] sm:$0xff]  ;;  %v334_v6 = vld [vmem:[%s975_s7 + $0x70] sm:$0xff]  ;;  %v333_v8 = vld [vmem:[%s975_s7 + $0x68] sm:$0xff]  ;;  %s272_s16 = sadd.s32 %s533_s13, %s270_s9  ;;  %s1004_s1 = scalar_lea.vmem [#allocation4], %s967_s12 }
  0x30   : > { %336 = vmatpush.msra.mxu0 %v335_v5  ;;  %v332_v9 = vld [vmem:[%s975_s7 + $0x60] sm:$0xff]  ;;  %v331_v10 = vld [vmem:[%s975_s7 + $0x58] sm:$0xff]  ;;  %v330_v11 = vld [vmem:[%s975_s7 + $0x50] sm:$0xff]  ;;  %s534_s10 = sshll.u32 %s272_s16, 2 }
  0x31   : > { %v329_v12 = vld [vmem:[%s975_s7 + $0x48] sm:$0xff]  ;;  %v328_v13 = vld [vmem:[%s975_s7 + $0x40] sm:$0xff]  ;;  %v327_v14 = vld [vmem:[%s975_s7 + $0x38] sm:$0xff]  ;;  %s274_s2 = scalar_lea.vmem %s1117_s0, %s534_s10 }
  0x32   : > { %337 = vmatpush.msra.mxu0 %v334_v6  ;;  %v326_v15 = vld [vmem:[%s975_s7 + $0x30] sm:$0xff]  ;;  %v325_v16 = vld [vmem:[%s975_s7 + $0x28] sm:$0xff]  ;;  %v324_v17 = vld [vmem:[%s975_s7 + $0x20] sm:$0xff] }
  0x33   : > { %v323_v18 = vld [vmem:[%s975_s7 + $0x18] sm:$0xff]  ;;  %v322_v19 = vld [vmem:[%s975_s7 + $0x10] sm:$0xff]  ;;  %v321_v20 = vld [vmem:[%s975_s7 + $0x8] sm:$0xff] }
  0x34   : > { %293 = vperm.xlu0 %650, %v283_v4   ;;  %652 = vset.pattern.permute.xlu1 %v810_v7  ;;  %v320_v21 = vld [vmem:[%s975_s7] sm:$0xff]  ;;  %s1093_s7 = sand.u32 1, %s781_s22  }
  0x35   : > { %305 = vperm.xlu1 %652, %v282_v0   ;;  %338 = vmatpush.msra.mxu0 %v333_v8  ;;  %v281_v23 = vld [vmem:[%s274_s2] sm:$0xf]  ;;  %s531_s2 = sshll.u32 %s1093_s7, 3 }
  0x36   : > { %v289_v25 = vperm.slane %v281_v23, 0  ;;  %v301_v26 = vperm.slane %v281_v23, 1  ;;  %v308_v27 = vperm.slane %v281_v23, 2  ;;  %v315_v29 = vperm.slane %v281_v23, 3  ;;  %s259_s8 = scalar_lea.vmem [#allocation2], %s531_s2 }
  0x37   : > { %339 = vmatpush.msra.mxu0 %v332_v9 }
  0x39   : > { %340 = vmatpush.msra.mxu0 %v331_v10 }
  0x3b   : > { %341 = vmatpush.msra.mxu0 %v330_v11 }
  0x3c   : > { %654 = vset.pattern.permute.xlu0 %v809_v3 }
  0x3d   : > { %342 = vmatpush.msra.mxu0 %v329_v12 }
  0x3f   : > { %343 = vmatpush.msra.mxu0 %v328_v13 }
  0x41   : > { %344 = vmatpush.msra.mxu0 %v327_v14 }
  0x43   : > { %345 = vmatpush.msra.mxu0 %v326_v15 }
  0x45   : > { %346 = vmatpush.msra.mxu0 %v325_v16 }
  0x47   : > { %347 = vmatpush.msra.mxu0 %v324_v17 }
  0x49   : > { %348 = vmatpush.msra.mxu0 %v323_v18 }
  0x4b   : > { %349 = vmatpush.msra.mxu0 %v322_v19 }
  0x4d   : > { %350 = vmatpush.msra.mxu0 %v321_v20 }
  0x4f   : > { %351 = vmatpush.msra.mxu0 %v320_v21 }
  0x88   : > { %v313_v31 = vpop.permute.xlu2 %312 }
  0x89   : > { %v316_v37 = vmul.f32 %v315_v29, %v313_v31 }
  0x9e   : > { %v287_v22 = vpop.permute.xlu0 %286  ;;  %v299_v24 = vpop.permute.xlu1 %298 }
  0x9f   : > { %v290_v28 = vmul.f32 %v289_v25, %v287_v22  ;;  %v302_v32 = vmul.f32 %v301_v26, %v299_v24 }
  0xa6   : > { %v294_v30 = vpop.permute.xlu0 %293 }
  0xa7   : > { %v296_v33 = vadd.f32 %v294_v30, %v290_v28  ;;  %v306_v34 = vpop.permute.xlu1 %305 }
  0xa8   : > { %v309_v35 = vmul.f32 %v308_v27, %v306_v34 }
  0xa9   : > { %v303_v36 = vadd.f32 %v302_v32, %v296_v33 }
  0xab   : > { %v310_v38 = vadd.f32 %v309_v35, %v303_v36 }
  0xad   : > { %v317_v39 = vadd.f32 %v316_v37, %v310_v38 }
  0xaf   : > { %v318_v40 = vmax.f32 %v317_v39, 0.0 }
  0xb1   : > { %319 = vst [vmem:[%s259_s8] sm:$0xff] %v318_v40  ;;  %352 = vmatmul.f32.vlgmr.msra.gmra.mxu0 %v318_v40 }
 0x12a   : > { %359 = sbr.rel (%p537_p8) target bundleno = 305 (0x131), region = 40 }
 0x12e   : > { %v353_v41 = vpop.f32.mrf.mxu0 }
 0x12f   : > { %vm360_vm0 = vcmask 130048   ;;  %v811_v42 = vmov 0.0  }
 0x130   : > { %361 = vst.msk [vmem:[%s1004_s1] sm:$0xff] %vm360_vm0, %v811_v42 }
 0x131 PF: > { %vm364_vm1 = vcmask 130048   ;;  %s540_s9 = sshll.u32 %s793_s25, 1  ;;  %s386_s13 = sshll.u32 %s259_s8, 4  ;;  %s387_s13 = int_to_ptr.vmem [resolvable:$true] %s386_s13 }
 0x132   : > { %s382_s12 = sadd.s32 %s789_s24, %s540_s9  ;;  %s542_s0 = sshll.u32 %s793_s25, 3 }
 0x133   : > { %s541_s16 = sshll.u32 %s382_s12, 3  ;;  %s398_s26 = scalar_lea.hbm %s1089_s5, %s542_s0 }
 0x134   : > { %s384_s2 = scalar_lea.hbm %s1088_s4, %s541_s16  ;;  %s1118_s30 = sand.u32 1, %s781_s22  }
 0x135   : > { %s388_s7 = sshll.u32 %s384_s2, 4  ;;  %s367_s23 = scalar_lea.sflag [#allocation3], %s1118_s30  ;;  %s389_s7 = int_to_ptr.hbm [resolvable:$true] %s388_s7 }
 0x136   : > { %s669_s29 = sshra.s32 %s389_s7, 4  ;;  %s675_s12 = scalar_lea.hbm %s1088_s4, 32  ;;  %s670_s29 = int_to_ptr.hbm [resolvable:$true] %s669_s29 }
 0x137   : > { %v362_v43 = vld [vmem:[%s1004_s1] sm:$0xff]  ;;  %s671_s24 = scalar_lea.hbm %s670_s29, 8  ;;  %p676_p0 = scmp.lt.s32.totalorder %s670_s29, %s1088_s4 }
 0x138   : > { %v363_v44 = vadd.f32 %v362_v43, %v353_v41  ;;  %p672_p9 = scmp.ne.s32.totalorder %s670_s29, %s671_s24  ;;  %p677_p1 = scmp.lt.s32.totalorder %s675_s12, %s671_s24 }
 0x13a   : > { %365 = vst.msk [vmem:[%s1004_s1] sm:$0xff] %vm364_vm1, %v363_v44  ;;  %p673_p10 = pnand %p672_p9, %p915_p3  ;;  %p678_p4 = por %p677_p1, %p676_p0 }
 0x13c   : > { %p674_p11 = pneg %p673_p10 }
 0x13e   : > { %p679_p2 = pnand %p678_p4, %p674_p11 }
 0x140   : > { %682 = shalt.err (!%p679_p2)
}
 0x141   : > { %545 = dma.vmem_to_hbm [thread:$0]  (%p915_p3), %s387_s13, 128, %s389_s7, %s367_s23  }
 0x142   : > { %s400_s0 = sshll.u32 %s1004_s1, 4  ;;  %s402_s3 = sshll.u32 %s398_s26, 4  ;;  %s401_s0 = int_to_ptr.vmem [resolvable:$true] %s400_s0  ;;  %s403_s3 = int_to_ptr.hbm [resolvable:$true] %s402_s3 }
 0x143   : > { %s1119_s27 = sand.u32 1, %s769_s19   ;;  %s697_s10 = sshra.s32 %s403_s3, 4  ;;  %s698_s10 = int_to_ptr.hbm [resolvable:$true] %s697_s10 }
 0x144   : > { %s372_s30 = scalar_lea.sflag [#allocation5], %s1119_s27  ;;  %s699_s15 = scalar_lea.hbm %s698_s10, 8 }
 0x145   : > { %p700_p5 = scmp.ne.s32.totalorder %s698_s10, %s699_s15  ;;  %s703_s11 = scalar_lea.hbm %s1089_s5, 16 }
 0x146   : > { %p704_p3 = scmp.lt.s32.totalorder %s698_s10, %s1089_s5  ;;  %p705_p9 = scmp.lt.s32.totalorder %s703_s11, %s699_s15 }
 0x147   : > { %p701_p6 = pnand %p700_p5, %p942_p12 }
 0x148   : > { %p706_p10 = por %p705_p9, %p704_p3 }
 0x149   : > { %p702_p8 = pneg %p701_p6 }
 0x14b   : > { %p707_p11 = pnand %p706_p10, %p702_p8 }
 0x14d   : > { %710 = shalt.err (!%p707_p11)
}
 0x14e   : > { %546 = dma.vmem_to_hbm [thread:$0]  (%p942_p12), %s401_s0, 128, %s403_s3, %s372_s30  }
 0x14f PF: > { %p556_p0 = scmp.ge.s32.totalorder %s805_s28, 2  ;;  %s414_s23 = sand.u32 1, %s777_s21  }
 0x150   : > { %s415_s26 = scalar_lea.sflag [#allocation3], %s414_s23 }
 0x151   : > { %p550_p1 = pnand %p556_p0, %p930_p7 }
 0x153   : > { %p551_p4 = pneg %p550_p1 }
 0x155   : > { %756 = dma.done.wait (%p551_p4), %s415_s26, 128  }
 0x156   : > { %758 = vsyncadd (%p551_p4), %s415_s26, 4294967168  ;;  %s424_s7 = sand.u32 1, %s765_s18   ;;  %p553_p2 = pnand %p556_p0, %p954_p13 }
 0x157   : > { %s425_s17 = scalar_lea.sflag [#allocation5], %s424_s7 }
 0x158   : > { %p554_p5 = pneg %p553_p2 }
 0x15a   : > { %760 = dma.done.wait (%p554_p5), %s425_s17, 128  }
 0x15b   : > { %762 = vsyncadd (%p554_p5), %s425_s17, 4294967168  ;;  %s22_s28 = sadd.s32 1, %s805_s28   ;;  %s1120_s21 = sld [smem:[#allocation13_spill]] }
 0x15c   : > { %p19_p12 = scmp.ge.s32.totalorder %s22_s28, 6   ;;  %s1121_s14 = sld [smem:[#allocation8_spill]] }
 0x15d   : > { %s1122_s23 = sld [smem:[#allocation14_spill]]  ;;  %s1127_s18 = smov %s769_s19 }
 0x15e   : > { %s1123_s24 = sld [smem:[#allocation9_spill]]  ;;  %s1128_s19 = smov %s773_s20 }
 0x15f   : > { %s1124_s25 = sld [smem:[#allocation10_spill]]  ;;  %21 = sbr.rel (!%p19_p12) target bundleno = 14 (0xe), region = 95 }
 0x160   : > { %s1125_s26 = sld [smem:[#allocation11_spill]] }
 0x161   : > { %s1126_s27 = sld [smem:[#allocation12_spill]]  ;;  %s1129_s20 = smov %s1120_s21 }
 0x162   : > { %s1130_s21 = smov %s781_s22  ;;  %s1131_s22 = smov %s1121_s14 }
 0x164   :  { %431 = vsyncpa [#allocation3], 1 }
 0x165   :  { %433 = vsyncpa [#allocation3 + $0x1], 1 }
 0x166   :  { %434 = vsyncpa [#allocation5], 1 }
 0x167   :  { %436 = vsyncpa [#allocation5 + $0x1], 1 }

</bundles_post_ra>
